<compile_context>
chip_gen: v5e
topology: v5e:2x2
jax: 0.10.0
libtpu: 0.0.40
codegen_flags: <defaults>
</compile_context>

<pallas_src>
import functools

import jax
import jax.numpy as jnp
from jax.experimental import pallas as pl
from jax.experimental.pallas import tpu as pltpu


def _round_up(x, m):
    return (x + m - 1) // m * m


def _vmem_capacity_bytes():
    """Best-effort physical VMEM query; None if unavailable (e.g. interpret mode)."""
    try:
        return int(pltpu.get_tpu_info().vmem_capacity_bytes)
    except Exception:
        return None


def _silu_gated_partial(x_ref, wgu_ref, bgu_ref, wd_ref):
    """down-proj partial sum (f32) for one intermediate tile of the SwiGLU MLP."""
    x = x_ref[...].astype(wgu_ref.dtype)  # f32 -> bf16 cast folded into the kernel
    # Fused gate/up matmul on the MXU (bf16 operands, f32 accumulation) + f32 bias.
    gu = jnp.dot(x, wgu_ref[...], preferred_element_type=jnp.float32) + bgu_ref[...]
    ti = gu.shape[-1] // 2
    g = gu[:, :ti]
    u = gu[:, ti:]
    # silu(g) * u in f32 (sigmoid -> EUP, multiplies -> VPU).
    h = (g * jax.nn.sigmoid(g)) * u
    # Partial down_proj for this intermediate slice.
    return jnp.dot(h.astype(wd_ref.dtype), wd_ref[...], preferred_element_type=jnp.float32)


def _mlp_kernel_f32_out(x_ref, wgu_ref, bgu_ref, wd_ref, bd_ref, o_ref):
    """f32 output: accumulate the I-reduction directly into the resident o_ref block."""
    k = pl.program_id(1)

    @pl.when(k == 0)
    def _init():
        o_ref[...] = jnp.zeros_like(o_ref)

    o_ref[...] += _silu_gated_partial(x_ref, wgu_ref, bgu_ref, wd_ref)

    @pl.when(k == pl.num_programs(1) - 1)
    def _finalize():
        o_ref[...] += bd_ref[...]


def _mlp_kernel_cast_out(x_ref, wgu_ref, bgu_ref, wd_ref, bd_ref, o_ref, acc_ref):
    """Narrow (e.g. bf16) output: f32 VMEM accumulator, cast + bias on the last k."""
    k = pl.program_id(1)

    @pl.when(k == 0)
    def _init():
        acc_ref[...] = jnp.zeros_like(acc_ref)

    acc_ref[...] += _silu_gated_partial(x_ref, wgu_ref, bgu_ref, wd_ref)

    @pl.when(k == pl.num_programs(1) - 1)
    def _finalize():
        o_ref[...] = (acc_ref[...] + bd_ref[...]).astype(o_ref.dtype)


def prepare_params(params, *, ti=None, weight_dtype=jnp.bfloat16, resident_budget_bytes=None):
    """One-time weight layout prep (do this outside the per-step forward).

    Packs gate/up weights into one [H, 2*I] matrix laid out so intermediate tile k of width
    `ti` holds [gate_k | up_k] contiguously, casts weights to bf16 for the MXU and keeps
    biases in f32.

    Returns ((wgu, bgu, wd, bd), ti) where `ti` is a *Python int* -- pass it to mlp_forward
    as a static keyword (functools.partial / static_argnames), never inside traced args.
    """
    wg, bg, wu, bu, wd, bd = params
    H, I = wg.shape
    if ti is None:
        wbytes = 3 * H * I * jnp.dtype(weight_dtype).itemsize  # gate + up + down, bf16
        if resident_budget_bytes is None:
            cap = _vmem_capacity_bytes()
            resident_budget_bytes = (cap // 3) if cap else 40 * 1024 * 1024
        if wbytes <= resident_budget_bytes:
            ti = I  # nI == 1: weights DMA'd once and stay VMEM-resident across token tiles
        else:
            ti = I
            for cand in (512, 384, 256, 128):  # prefer ti >= 256 for v6e/v7x MXU depth
                if I % cand == 0:
                    ti = cand
                    break
    assert I % ti == 0, "intermediate tile must divide intermediate_size"
    assert ti == I or ti % 128 == 0, "intermediate tile must be lane-aligned (multiple of 128)"
    nI = I // ti
    wgu = jnp.concatenate(
        [wg.reshape(H, nI, ti), wu.reshape(H, nI, ti)], axis=-1
    ).reshape(H, 2 * I).astype(weight_dtype)
    bgu = jnp.concatenate(
        [bg.reshape(nI, ti), bu.reshape(nI, ti)], axis=-1
    ).reshape(1, 2 * I).astype(jnp.float32)
    wd_p = wd.astype(weight_dtype)                 # (I, H)
    bd_p = bd.reshape(1, H).astype(jnp.float32)    # (1, H)
    return (wgu, bgu, wd_p, bd_p), int(ti)


def mlp_forward(x, wgu, bgu, wd, bd, *, ti, tm=512, out_dtype=None, vmem_limit_bytes=None):
    """x: [B, S, H] (f32 or bf16).  Weights from prepare_params.  Returns [B, S, H].

    `ti` must be the static Python int returned by prepare_params.
    tm guidance: v5e ~256, v6e 768-1024, v7x 384-512 (subject to VMEM).
    """
    B, S, H = x.shape
    I = wd.shape[0]
    assert I % ti == 0
    nI = I // ti
    T = B * S
    out_dtype = jnp.dtype(x.dtype if out_dtype is None else out_dtype)

    # Token tile: as large as requested, clamped to the 16-aligned token count
    # (bf16 packs 16 rows per vreg tile).
    tm_eff = min(tm, _round_up(T, 16))
    # With resident weights and a single token tile, split in two so the second
    # TensorCore on v7x gets work (negligible cost on 1-TC chips).
    if nI == 1 and T > 16 and _round_up(T, tm_eff) == tm_eff:
        tm_eff = _round_up((T + 1) // 2, 16)
    T_pad = _round_up(T, tm_eff)

    x2d = x.reshape(T, H)  # no cast here: the bf16 cast happens inside the kernel
    if T_pad != T:
        x2d = jnp.pad(x2d, ((0, T_pad - T), (0, 0)))
    n_tok = T_pad // tm_eff

    if vmem_limit_bytes is None:
        cap = _vmem_capacity_bytes()
        if cap is not None:
            # ~75% of physical VMEM (~96 MiB on 128 MiB v5e/v6e, ~48 MiB on v7x per-core).
            vmem_limit_bytes = min(int(cap * 3 // 4), 112 * 1024 * 1024)

    # Constant-index blocks gain nothing from double-buffering: single-buffer them.
    # When nI > 1 the weight tiles stream with the default double-buffering.
    # (If per-step compute is very short, a Buffered(3) sweep on the streaming tiles can help.)
    const_buf = pl.Buffered(buffer_count=1)
    w_mode = const_buf if nI == 1 else None

    weight_bytes = (wgu.size * wgu.dtype.itemsize + wd.size * wd.dtype.itemsize
                    + bgu.size * bgu.dtype.itemsize + bd.size * bd.dtype.itemsize)
    cost = pl.CostEstimate(
        flops=6 * T_pad * H * I,            # gate/up fused (2*T*H*2I) + down (2*T*I*H)
        transcendentals=T_pad * I,          # sigmoid
        bytes_accessed=int(x2d.size * x2d.dtype.itemsize
                           + weight_bytes * (1 if nI == 1 else n_tok)
                           + T_pad * H * out_dtype.itemsize),
    )

    if out_dtype == jnp.float32:
        kernel = _mlp_kernel_f32_out
        scratch = []                        # accumulate directly into the resident o_ref block
    else:
        kernel = _mlp_kernel_cast_out
        scratch = [pltpu.VMEM((tm_eff, H), jnp.float32)]

    out2d = pl.pallas_call(
        kernel,
        out_shape=jax.ShapeDtypeStruct((T_pad, H), out_dtype),
        grid_spec=pltpu.PrefetchScalarGridSpec(
            num_scalar_prefetch=0,
            grid=(n_tok, nI),
            in_specs=[
                pl.BlockSpec((tm_eff, H), lambda i, k: (i, 0)),                        # x tile
                pl.BlockSpec((H, 2 * ti), lambda i, k: (0, k), pipeline_mode=w_mode),  # Wgu tile
                pl.BlockSpec((1, 2 * ti), lambda i, k: (0, k), pipeline_mode=w_mode),  # bgu tile
                pl.BlockSpec((ti, H), lambda i, k: (k, 0), pipeline_mode=w_mode),      # Wd tile
                pl.BlockSpec((1, H), lambda i, k: (0, 0), pipeline_mode=const_buf),    # bd
            ],
            out_specs=pl.BlockSpec((tm_eff, H), lambda i, k: (i, 0)),
            scratch_shapes=scratch,
        ),
        compiler_params=pltpu.CompilerParams(
            dimension_semantics=("parallel", "arbitrary"),
            vmem_limit_bytes=vmem_limit_bytes,
        ),
        cost_estimate=cost,
    )(x2d, wgu, bgu, wd, bd)

    return out2d[:T].reshape(B, S, H)


def init_params(key, hidden_size, intermediate_size, dtype=jnp.float32):
    """Deterministic synthetic parameters (same shapes as the PyTorch module,
    stored pre-transposed as [in, out])."""
    k = jax.random.split(key, 6)
    scale_h = 1.0 / jnp.sqrt(hidden_size)
    scale_i = 1.0 / jnp.sqrt(intermediate_size)
    wg = jax.random.uniform(k[0], (hidden_size, intermediate_size), dtype, -scale_h, scale_h)
    bg = jax.random.uniform(k[1], (intermediate_size,), dtype, -scale_h, scale_h)
    wu = jax.random.uniform(k[2], (hidden_size, intermediate_size), dtype, -scale_h, scale_h)
    bu = jax.random.uniform(k[3], (intermediate_size,), dtype, -scale_h, scale_h)
    wd = jax.random.uniform(k[4], (intermediate_size, hidden_size), dtype, -scale_i, scale_i)
    bd = jax.random.uniform(k[5], (hidden_size,), dtype, -scale_i, scale_i)
    return wg, bg, wu, bu, wd, bd


def mlp_reference(x, params):
    """Pure-JAX f32 reference matching the PyTorch forward."""
    wg, bg, wu, bu, wd, bd = params
    g = jax.nn.silu(x @ wg + bg)
    u = x @ wu + bu
    return (g * u) @ wd + bd


def mlp_reference_bf16(x, params):
    """Reference with the same bf16-operand / f32-accumulation scheme as the kernel."""
    wg, bg, wu, bu, wd, bd = params
    xb = x.astype(jnp.bfloat16)
    g = jnp.dot(xb, wg.astype(jnp.bfloat16), preferred_element_type=jnp.float32) + bg
    u = jnp.dot(xb, wu.astype(jnp.bfloat16), preferred_element_type=jnp.float32) + bu
    h = ((g * jax.nn.sigmoid(g)) * u).astype(jnp.bfloat16)
    return jnp.dot(h, wd.astype(jnp.bfloat16), preferred_element_type=jnp.float32) + bd


if __name__ == "__main__":
    # Small shapes consistent with the module: batch=2, seq=8,
    # hidden_size=128, intermediate_size=256 (lane-aligned for TPU).
    B, S, H, I = 2, 8, 128, 256

    key = jax.random.PRNGKey(0)
    kx, kp = jax.random.split(key)
    x = jax.random.normal(kx, (B, S, H), dtype=jnp.float32)
    params = init_params(kp, H, I)

    ref_f32 = mlp_reference(x, params)
    ref_bf16 = mlp_reference_bf16(x, params)

    # Path 1: auto tiling -> weights fully VMEM-resident (ti == I, nI == 1), f32 output,
    # reduction accumulated directly into o_ref.
    prepared, ti = prepare_params(params)
    fwd = jax.jit(functools.partial(mlp_forward, ti=ti, tm=512))
    out = jax.block_until_ready(fwd(x, *prepared))
    assert out.shape == (B, S, H) and out.dtype == x.dtype
    assert jnp.allclose(out, ref_bf16, atol=1e-3, rtol=1e-3), "mismatch vs bf16-matched reference"
    assert jnp.allclose(out, ref_f32, atol=5e-2, rtol=5e-2), "mismatch vs f32 reference"

    # Path 2: streamed weight tiles (ti=128 -> nI=2 exercises the reduction axis) + bf16 output
    # (exercises the f32-scratch finalize path).
    prepared2, ti2 = prepare_params(params, ti=128)
    fwd2 = jax.jit(functools.partial(mlp_forward, ti=ti2, tm=256, out_dtype=jnp.bfloat16))
    out2 = jax.block_until_ready(fwd2(x, *prepared2))
    assert out2.shape == (B, S, H) and out2.dtype == jnp.bfloat16
    assert jnp.allclose(out2.astype(jnp.float32), ref_bf16, atol=2e-2, rtol=2e-2), \
        "mismatch vs bf16-matched reference (bf16 output path)"

    print("KERNEL_OK")
</pallas_src>

<mosaic_0001>
module attributes {stable_mosaic.version = 11 : i64} {
  func.func @_mlp_kernel_f32_out(%arg0: i32, %arg1: i32, %arg2: memref<16x128xf32, #tpu.memory_space<vmem>>, %arg3: memref<128x512xbf16, #tpu.memory_space<vmem>>, %arg4: memref<1x512xf32, #tpu.memory_space<vmem>>, %arg5: memref<256x128xbf16, #tpu.memory_space<vmem>>, %arg6: memref<1x128xf32, #tpu.memory_space<vmem>>, %arg7: memref<16x128xf32, #tpu.memory_space<vmem>>) attributes {dimension_semantics = [#tpu.dimension_semantics<parallel>, #tpu.dimension_semantics<arbitrary>], iteration_bounds = array<i64: 1, 1>, scalar_prefetch = 0 : i64, scratch_operands = 0 : i64, tpu.core_type = #tpu.core_type<tc>, window_params = [{transform_indices = @transform_0, window_bounds = array<i64: 16, 128>}, {pipeline_mode = #tpu.pipeline_mode<synchronous>, transform_indices = @transform_1, window_bounds = array<i64: 128, 512>}, {pipeline_mode = #tpu.pipeline_mode<synchronous>, transform_indices = @transform_2, window_bounds = array<i64: 1, 512>}, {pipeline_mode = #tpu.pipeline_mode<synchronous>, transform_indices = @transform_3, window_bounds = array<i64: 256, 128>}, {pipeline_mode = #tpu.pipeline_mode<synchronous>, transform_indices = @transform_4, window_bounds = array<i64: 1, 128>}, {transform_indices = @transform_5, window_bounds = array<i64: 16, 128>}]} {
    %c0_i32 = arith.constant 0 : i32
    %0 = arith.cmpi eq, %arg1, %c0_i32 : i32
    %1 = arith.extui %0 : i1 to i32
    %c0_i32_0 = arith.constant 0 : i32
    %2 = arith.cmpi ne, %1, %c0_i32_0 : i32
    scf.if %2 {
      %cst_16 = arith.constant 0.000000e+00 : f32
      %28 = vector.broadcast %cst_16 : f32 to vector<16x128xf32>
      %c0_17 = arith.constant 0 : index
      %c0_18 = arith.constant 0 : index
      %29 = vector.load %arg7[%c0_17, %c0_18] : memref<16x128xf32, #tpu.memory_space<vmem>>, vector<16x128xf32>
      tpu.vector_store %arg7[%c0_17, %c0_18], %28 {strides = array<i32>} : memref<16x128xf32, #tpu.memory_space<vmem>>, vector<16x128xf32>,
    } else {
    }
    %c0 = arith.constant 0 : index
    %c0_1 = arith.constant 0 : index
    %3 = vector.load %arg7[%c0, %c0_1] : memref<16x128xf32, #tpu.memory_space<vmem>>, vector<16x128xf32>
    %c0_2 = arith.constant 0 : index
    %c0_3 = arith.constant 0 : index
    %4 = vector.load %arg2[%c0_2, %c0_3] : memref<16x128xf32, #tpu.memory_space<vmem>>, vector<16x128xf32>
    %5 = arith.truncf %4 : vector<16x128xf32> to vector<16x128xbf16>
    %c0_4 = arith.constant 0 : index
    %c0_5 = arith.constant 0 : index
    %6 = vector.load %arg3[%c0_4, %c0_5] : memref<128x512xbf16, #tpu.memory_space<vmem>>, vector<128x512xbf16>
    %cst = arith.constant dense<0.000000e+00> : vector<16x512xf32>
    %7 = tpu.matmul %5, %6, %cst {dimension_numbers = #tpu.dot_dimension_numbers<[1], [0], [0], [1], [0, 0, 1, 1], [], []>} : vector<16x128xbf16>, vector<128x512xbf16>, vector<16x512xf32> -> vector<16x512xf32>
    %c0_6 = arith.constant 0 : index
    %c0_7 = arith.constant 0 : index
    %8 = vector.load %arg4[%c0_6, %c0_7] : memref<1x512xf32, #tpu.memory_space<vmem>>, vector<1x512xf32>
    %9 = vector.broadcast %8 : vector<1x512xf32> to vector<16x512xf32>
    %10 = arith.addf %7, %9 : vector<16x512xf32>
    %11 = vector.extract_strided_slice %10 {offsets = [0, 0], sizes = [16, 256], strides = [1, 1]} : vector<16x512xf32> to vector<16x256xf32>
    %12 = vector.extract_strided_slice %10 {offsets = [0, 256], sizes = [16, 256], strides = [1, 1]} : vector<16x512xf32> to vector<16x256xf32>
    %13 = arith.negf %11 : vector<16x256xf32>
    %14 = math.exp %13 : vector<16x256xf32>
    %cst_8 = arith.constant 1.000000e+00 : f32
    %15 = vector.broadcast %cst_8 : f32 to vector<16x256xf32>
    %16 = arith.addf %15, %14 : vector<16x256xf32>
    %17 = arith.divf %15, %16 : vector<16x256xf32>
    %18 = arith.mulf %11, %17 : vector<16x256xf32>
    %19 = arith.mulf %18, %12 : vector<16x256xf32>
    %20 = arith.truncf %19 : vector<16x256xf32> to vector<16x256xbf16>
    %c0_9 = arith.constant 0 : index
    %c0_10 = arith.constant 0 : index
    %21 = vector.load %arg5[%c0_9, %c0_10] : memref<256x128xbf16, #tpu.memory_space<vmem>>, vector<256x128xbf16>
    %cst_11 = arith.constant dense<0.000000e+00> : vector<16x128xf32>
    %22 = tpu.matmul %20, %21, %cst_11 {dimension_numbers = #tpu.dot_dimension_numbers<[1], [0], [0], [1], [0, 0, 1, 1], [], []>} : vector<16x256xbf16>, vector<256x128xbf16>, vector<16x128xf32> -> vector<16x128xf32>
    %23 = arith.addf %3, %22 : vector<16x128xf32>
    %c0_12 = arith.constant 0 : index
    %c0_13 = arith.constant 0 : index
    %24 = vector.load %arg7[%c0_12, %c0_13] : memref<16x128xf32, #tpu.memory_space<vmem>>, vector<16x128xf32>
    tpu.vector_store %arg7[%c0_12, %c0_13], %23 {strides = array<i32>} : memref<16x128xf32, #tpu.memory_space<vmem>>, vector<16x128xf32>,
    %c0_i32_14 = arith.constant 0 : i32
    %25 = arith.cmpi eq, %arg1, %c0_i32_14 : i32
    %26 = arith.extui %25 : i1 to i32
    %c0_i32_15 = arith.constant 0 : i32
    %27 = arith.cmpi ne, %26, %c0_i32_15 : i32
    scf.if %27 {
      %c0_16 = arith.constant 0 : index
      %c0_17 = arith.constant 0 : index
      %28 = vector.load %arg7[%c0_16, %c0_17] : memref<16x128xf32, #tpu.memory_space<vmem>>, vector<16x128xf32>
      %c0_18 = arith.constant 0 : index
      %c0_19 = arith.constant 0 : index
      %29 = vector.load %arg6[%c0_18, %c0_19] : memref<1x128xf32, #tpu.memory_space<vmem>>, vector<1x128xf32>
      %30 = vector.broadcast %29 : vector<1x128xf32> to vector<16x128xf32>
      %31 = arith.addf %28, %30 : vector<16x128xf32>
      %c0_20 = arith.constant 0 : index
      %c0_21 = arith.constant 0 : index
      %32 = vector.load %arg7[%c0_20, %c0_21] : memref<16x128xf32, #tpu.memory_space<vmem>>, vector<16x128xf32>
      tpu.vector_store %arg7[%c0_20, %c0_21], %31 {strides = array<i32>} : memref<16x128xf32, #tpu.memory_space<vmem>>, vector<16x128xf32>,
    } else {
    }
    return
  }
  func.func @transform_0(%arg0: i32, %arg1: i32) -> (i32, i32) {
    %c0_i32 = arith.constant 0 : i32
    %c0_i32_0 = arith.constant 0 : i32
    return %arg0, %c0_i32 : i32, i32
  }
  func.func @transform_1(%arg0: i32, %arg1: i32) -> (i32, i32) {
    %c0_i32 = arith.constant 0 : i32
    %c0_i32_0 = arith.constant 0 : i32
    return %c0_i32, %arg1 : i32, i32
  }
  func.func @transform_2(%arg0: i32, %arg1: i32) -> (i32, i32) {
    %c0_i32 = arith.constant 0 : i32
    %c0_i32_0 = arith.constant 0 : i32
    return %c0_i32, %arg1 : i32, i32
  }
  func.func @transform_3(%arg0: i32, %arg1: i32) -> (i32, i32) {
    %c0_i32 = arith.constant 0 : i32
    %c0_i32_0 = arith.constant 0 : i32
    return %arg1, %c0_i32 : i32, i32
  }
  func.func @transform_4(%arg0: i32, %arg1: i32) -> (i32, i32) {
    %c0_i32 = arith.constant 0 : i32
    %c0_i32_0 = arith.constant 0 : i32
    %c0_i32_1 = arith.constant 0 : i32
    return %c0_i32, %c0_i32_0 : i32, i32
  }
  func.func @transform_5(%arg0: i32, %arg1: i32) -> (i32, i32) {
    %c0_i32 = arith.constant 0 : i32
    %c0_i32_0 = arith.constant 0 : i32
    return %arg0, %c0_i32 : i32, i32
  }
}

</mosaic_0001>

<bundles_post_ra>
// kernel: mlp_forward.1
= control target key start
LH: loop header
LB: loop body
LE: loop exit
PB: predicated region body
PF: predicated region fallthrough
CT: control target
= control target key end

     0   :  { %10 = vsyncpa [#allocation3], 0  ;;  %s1138_s0 = inlined_call_operand.hbm [shape: f32[16,128], index: 0, kind: input, shape index: {}]   ;;  %s1139_s1 = inlined_call_operand.hbm [shape: bf16[128,512], index: 1, kind: input, shape index: {}]   ;;  %s1140_s2 = inlined_call_operand.hbm [shape: f32[1,512], index: 2, kind: input, shape index: {}]   ;;  %s1141_s3 = inlined_call_operand.hbm [shape: bf16[256,128], index: 3, kind: input, shape index: {}]   ;;  %s1142_s4 = inlined_call_operand.vmem [shape: f32[1,128], index: 4, kind: input, shape index: {}]   ;;  %s1143_s5 = inlined_call_operand.hbm [shape: f32[16,128], index: 5, kind: output, shape index: {}]  }
   0x1   :  { %11 = vsyncpa [#allocation6], 0 }
   0x2   :  { %12 = vsyncpa [#allocation9], 0  ;;  %s31_s20 = sshll.u32 %s1139_s1, 4  ;;  %s32_s20 = int_to_ptr.hbm [resolvable:$true] %s31_s20 }
   0x3   :  { %13 = vsyncpa [#allocation4], 0  ;;  %s1032_s21 = smov [#allocation5]   ;;  %s18_s25 = sshll.u32 %s1138_s0, 4  ;;  %s19_s25 = int_to_ptr.hbm [resolvable:$true] %s18_s25 }
   0x4   :  { %s33_s22 = sshll.u32 %s1032_s21, 4  ;;  %s1033_s26 = smov 256   ;;  %s34_s22 = int_to_ptr.vmem [resolvable:$true] %s33_s22 }
   0x5   :  { %s1034_s27 = smov 16   ;;  %s1035_s28 = smov [#allocation2]  }
   0x6   :  { %39 = dma.hbm_to_vmem [thread:$0]  %s32_s20, 4096, %s34_s22, [#allocation6], %s1033_s26, %s1033_s26, %s1034_s27  }
   0x7   :  { %s20_s29 = sshll.u32 %s1035_s28, 4  ;;  %s1036_s30 = smov 128   ;;  %s21_s29 = int_to_ptr.vmem [resolvable:$true] %s20_s29 }
   0x8   :  { %s1037_s6 = smov 8   ;;  %s45_s8 = sshll.u32 %s1140_s2, 4  ;;  %s46_s8 = int_to_ptr.hbm [resolvable:$true] %s45_s8 }
   0x9   :  { %26 = dma.hbm_to_vmem [thread:$0]  %s19_s25, 256, %s21_s29, [#allocation3], %s1036_s30, %s1036_s30, %s1037_s6  }
   0xa   :  { %s1038_s9 = smov [#allocation7]   ;;  %s55_s12 = sshll.u32 %s1141_s3, 4  ;;  %s56_s12 = int_to_ptr.hbm [resolvable:$true] %s55_s12 }
   0xb   :  { %s47_s0 = sshll.u32 %s1038_s9, 4  ;;  %s1039_s13 = smov [#allocation8]   ;;  %s48_s0 = int_to_ptr.vmem [resolvable:$true] %s47_s0 }
   0xc   :  { %50 = dma.hbm_to_vmem [thread:$0]  %s46_s8, 64, %s48_s0, [#allocation6]  }
   0xd   :  { %s57_s14 = sshll.u32 %s1039_s13, 4  ;;  %s1040_s15 = smov 64   ;;  %s58_s14 = int_to_ptr.vmem [resolvable:$true] %s57_s14 }
   0xe   :  { %s1041_s16 = smov 4  }
   0xf   :  { %63 = dma.hbm_to_vmem [thread:$0]  %s56_s12, 2048, %s58_s14, [#allocation9], %s1040_s15, %s1040_s15, %s1041_s16  }
  0x10   :  { %1024 = dma.done.wait [#allocation3], 256  }
  0x11   :  { %1025 = vsyncadd [#allocation3], 4294967040 }
  0x12   :  { %1026 = dma.done.wait [#allocation6], 4160  }
  0x13   :  { %1027 = vsyncadd [#allocation6], 4294963136 }
  0x14   :  { %1028 = dma.done.wait [#allocation9], 2048  }
  0x15   :  { %1029 = vsyncadd [#allocation9], 4294965248  ;;  %v745_v0 = vld [vmem:[#allocation5 + $0xe0] sm:$0xf]  ;;  %v857_v1 = vld [vmem:[#allocation5 + $0xec] sm:$0xf0] }
  0x16   :  { %v855_v2 = vld [vmem:[#allocation5 + $0xe4] sm:$0xf]  ;;  %v746_v3 = vor.u32 %v857_v1, %v745_v0  ;;  %v747_v4 = vld [vmem:[#allocation5 + $0xf0] sm:$0xf0]  ;;  %v729_v5 = vld [vmem:[#allocation5 + $0xc0] sm:$0xf] }
  0x17   :  { %v853_v6 = vld [vmem:[#allocation5 + $0xcc] sm:$0xf0]  ;;  %v750_v7 = vor.u32 %v855_v2, %v747_v4  ;;  %v851_v8 = vld [vmem:[#allocation5 + $0xc4] sm:$0xf]  ;;  %v731_v9 = vld [vmem:[#allocation5 + $0xd0] sm:$0xf0] }
  0x18   :  { %295 = vmatpush.bf16.msra.mxu0 %v746_v3  ;;  %v730_v10 = vor.u32 %v853_v6, %v729_v5  ;;  %v734_v11 = vor.u32 %v851_v8, %v731_v9  ;;  %v713_v12 = vld [vmem:[#allocation5 + $0xa0] sm:$0xf]  ;;  %v849_v13 = vld [vmem:[#allocation5 + $0xac] sm:$0xf0]  ;;  %v847_v14 = vld [vmem:[#allocation5 + $0xa4] sm:$0xf] }
  0x19   :  { %309 = vmatpush.bf16.msra.mxu1 %v750_v7  ;;  %v715_v15 = vld [vmem:[#allocation5 + $0xb0] sm:$0xf0]  ;;  %v753_v16 = vld [vmem:[#allocation5 + $0xe8] sm:$0xf]  ;;  %v714_v17 = vor.u32 %v849_v13, %v713_v12  ;;  %v858_v18 = vld [vmem:[#allocation5 + $0xf4] sm:$0xf0] }
  0x1a   :  { %v856_v19 = vld [vmem:[#allocation5 + $0xec] sm:$0xf]  ;;  %v755_v20 = vld [vmem:[#allocation5 + $0xf8] sm:$0xf0]  ;;  %v718_v21 = vor.u32 %v847_v14, %v715_v15  ;;  %v697_v22 = vld [vmem:[#allocation5 + $0x80] sm:$0xf]  ;;  %v754_v25 = vor.u32 %v858_v18, %v753_v16 }
  0x1b   :  { %v845_v23 = vld [vmem:[#allocation5 + $0x8c] sm:$0xf0]  ;;  %v843_v24 = vld [vmem:[#allocation5 + $0x84] sm:$0xf]  ;;  %v758_v26 = vor.u32 %v856_v19, %v755_v20  ;;  %v699_v27 = vld [vmem:[#allocation5 + $0x90] sm:$0xf0] }
  0x1c   :  { %296 = vmatpush.bf16.msra.mxu0 %v730_v10  ;;  %v737_v28 = vld [vmem:[#allocation5 + $0xc8] sm:$0xf]  ;;  %v854_v29 = vld [vmem:[#allocation5 + $0xd4] sm:$0xf0]  ;;  %323 = vmatpush.bf16.msra.mxu2 %v754_v25  ;;  %v852_v31 = vld [vmem:[#allocation5 + $0xcc] sm:$0xf]  ;;  %v698_v33 = vor.u32 %v845_v23, %v697_v22  ;;  %v702_v37 = vor.u32 %v843_v24, %v699_v27 }
  0x1d   :  { %310 = vmatpush.bf16.msra.mxu1 %v734_v11  ;;  %337 = vmatpush.bf16.msra.mxu3 %v758_v26  ;;  %v738_v30 = vor.u32 %v854_v29, %v737_v28  ;;  %v739_v32 = vld [vmem:[#allocation5 + $0xd8] sm:$0xf0]  ;;  %v681_v34 = vld [vmem:[#allocation5 + $0x60] sm:$0xf]  ;;  %v841_v35 = vld [vmem:[#allocation5 + $0x6c] sm:$0xf0] }
  0x1e   :  { %v742_v36 = vor.u32 %v852_v31, %v739_v32  ;;  %v721_v38 = vld [vmem:[#allocation5 + $0xa8] sm:$0xf]  ;;  %v850_v39 = vld [vmem:[#allocation5 + $0xb4] sm:$0xf0]  ;;  %v848_v40 = vld [vmem:[#allocation5 + $0xac] sm:$0xf]  ;;  %v682_v47 = vor.u32 %v841_v35, %v681_v34 }
  0x1f   :  { %v839_v41 = vld [vmem:[#allocation5 + $0x64] sm:$0xf]  ;;  %v683_v42 = vld [vmem:[#allocation5 + $0x70] sm:$0xf0]  ;;  %v723_v43 = vld [vmem:[#allocation5 + $0xb8] sm:$0xf0]  ;;  %v722_v44 = vor.u32 %v850_v39, %v721_v38 }
  0x20   :  { %297 = vmatpush.bf16.msra.mxu0 %v714_v17  ;;  %324 = vmatpush.bf16.msra.mxu2 %v738_v30  ;;  %v726_v45 = vor.u32 %v848_v40, %v723_v43  ;;  %v705_v46 = vld [vmem:[#allocation5 + $0x88] sm:$0xf]  ;;  %v846_v48 = vld [vmem:[#allocation5 + $0x94] sm:$0xf0]  ;;  %v844_v49 = vld [vmem:[#allocation5 + $0x8c] sm:$0xf]  ;;  %v686_v51 = vor.u32 %v839_v41, %v683_v42 }
  0x21   :  { %311 = vmatpush.bf16.msra.mxu1 %v718_v21  ;;  %338 = vmatpush.bf16.msra.mxu3 %v742_v36  ;;  %v707_v50 = vld [vmem:[#allocation5 + $0x98] sm:$0xf0]  ;;  %v665_v52 = vld [vmem:[#allocation5 + $0x40] sm:$0xf]  ;;  %v837_v53 = vld [vmem:[#allocation5 + $0x4c] sm:$0xf0]  ;;  %v706_v56 = vor.u32 %v846_v48, %v705_v46 }
  0x22   :  { %v835_v54 = vld [vmem:[#allocation5 + $0x44] sm:$0xf]  ;;  %v667_v55 = vld [vmem:[#allocation5 + $0x50] sm:$0xf0]  ;;  %v710_v57 = vor.u32 %v844_v49, %v707_v50  ;;  %v689_v58 = vld [vmem:[#allocation5 + $0x68] sm:$0xf]  ;;  %v666_v59 = vor.u32 %v837_v53, %v665_v52 }
  0x23   :  { %v842_v60 = vld [vmem:[#allocation5 + $0x74] sm:$0xf0]  ;;  %v840_v61 = vld [vmem:[#allocation5 + $0x6c] sm:$0xf]  ;;  %v691_v62 = vld [vmem:[#allocation5 + $0x78] sm:$0xf0]  ;;  %v670_v63 = vor.u32 %v835_v54, %v667_v55 }
  0x24   :  { %298 = vmatpush.bf16.msra.mxu0 %v698_v33  ;;  %325 = vmatpush.bf16.msra.mxu2 %v722_v44  ;;  %v649_v0 = vld [vmem:[#allocation5 + $0x20] sm:$0xf]  ;;  %v833_v1 = vld [vmem:[#allocation5 + $0x2c] sm:$0xf0]  ;;  %v831_v2 = vld [vmem:[#allocation5 + $0x24] sm:$0xf]  ;;  %v690_v4 = vor.u32 %v842_v60, %v689_v58  ;;  %v694_v5 = vor.u32 %v840_v61, %v691_v62 }
  0x25   :  { %312 = vmatpush.bf16.msra.mxu1 %v702_v37  ;;  %339 = vmatpush.bf16.msra.mxu3 %v726_v45  ;;  %v651_v3 = vld [vmem:[#allocation5 + $0x30] sm:$0xf0]  ;;  %v673_v6 = vld [vmem:[#allocation5 + $0x48] sm:$0xf]  ;;  %v650_v7 = vor.u32 %v833_v1, %v649_v0  ;;  %v838_v8 = vld [vmem:[#allocation5 + $0x54] sm:$0xf0] }
  0x26   :  { %v836_v9 = vld [vmem:[#allocation5 + $0x4c] sm:$0xf]  ;;  %v675_v10 = vld [vmem:[#allocation5 + $0x58] sm:$0xf0]  ;;  %v654_v11 = vor.u32 %v831_v2, %v651_v3  ;;  %v633_v12 = vld [vmem:[#allocation5] sm:$0xf]  ;;  %v674_v17 = vor.u32 %v838_v8, %v673_v6 }
  0x27   :  { %v829_v13 = vld [vmem:[#allocation5 + $0xc] sm:$0xf0]  ;;  %v827_v14 = vld [vmem:[#allocation5 + $0x4] sm:$0xf]  ;;  %v635_v15 = vld [vmem:[#allocation5 + $0x10] sm:$0xf0]  ;;  %v678_v18 = vor.u32 %v836_v9, %v675_v10 }
  0x28   :  { %299 = vmatpush.bf16.msra.mxu0 %v682_v47  ;;  %326 = vmatpush.bf16.msra.mxu2 %v706_v56  ;;  %v90_v16 = vld [vmem:[#allocation2] sm:$0xff]  ;;  %v634_v19 = vor.u32 %v829_v13, %v633_v12  ;;  %v91_v20 = vld [vmem:[#allocation2 + $0x8] sm:$0xff]  ;;  %v657_v21 = vld [vmem:[#allocation5 + $0x28] sm:$0xf]  ;;  %v638_v23 = vor.u32 %v827_v14, %v635_v15  ;;  %s1042_s17 = smov [#allocation10]   ;;  %s616_s21 = sshll.u32 %s1143_s5, 4  ;;  %s617_s21 = int_to_ptr.hbm [resolvable:$true] %s616_s21 }
  0x29   :  { %313 = vmatpush.bf16.msra.mxu1 %v686_v51  ;;  %340 = vmatpush.bf16.msra.mxu3 %v710_v57  ;;  %v834_v22 = vld [vmem:[#allocation5 + $0x34] sm:$0xf0]  ;;  %v832_v24 = vld [vmem:[#allocation5 + $0x2c] sm:$0xf]  ;;  %v659_v25 = vld [vmem:[#allocation5 + $0x38] sm:$0xf0]  ;;  %v92_v26 = vpack.c.bf16 %v91_v20, %v90_v16 }
  0x2a   :  { %v658_v27 = vor.u32 %v834_v22, %v657_v21  ;;  %v662_v28 = vor.u32 %v832_v24, %v659_v25  ;;  %v641_v29 = vld [vmem:[#allocation5 + $0x8] sm:$0xf]  ;;  %v830_v30 = vld [vmem:[#allocation5 + $0x14] sm:$0xf0]  ;;  %v828_v31 = vld [vmem:[#allocation5 + $0xc] sm:$0xf] }
  0x2b   :  { %v643_v32 = vld [vmem:[#allocation5 + $0x18] sm:$0xf0]  ;;  %v642_v33 = vor.u32 %v830_v30, %v641_v29  ;;  %v865_v37 = vld [vmem:[#allocation8 + $0x30] sm:$0xff]  ;;  %v864_v39 = vld [vmem:[#allocation8 + $0x28] sm:$0xff]  ;;  %s614_s18 = sshll.u32 %s1042_s17, 4  ;;  %s615_s18 = int_to_ptr.vmem [resolvable:$true] %s614_s18 }
  0x2c   :  { %300 = vmatpush.bf16.msra.mxu0 %v666_v59  ;;  %327 = vmatpush.bf16.msra.mxu2 %v690_v4  ;;  %v646_v34 = vor.u32 %v828_v31, %v643_v32  ;;  %v866_v35 = vld [vmem:[#allocation8 + $0x38] sm:$0xff]  ;;  %v873_v38 = vld [vmem:[#allocation8 + $0x70] sm:$0xff]  ;;  %v872_v40 = vld [vmem:[#allocation8 + $0x68] sm:$0xff] }
  0x2d   :  { %314 = vmatpush.bf16.msra.mxu1 %v670_v63  ;;  %341 = vmatpush.bf16.msra.mxu3 %v694_v5  ;;  %v874_v36 = vld [vmem:[#allocation8 + $0x78] sm:$0xff]  ;;  %v863_v42 = vld [vmem:[#allocation8 + $0x20] sm:$0xff]  ;;  %v861_v54 = vld [vmem:[#allocation8 + $0x10] sm:$0xff] }
  0x2e   :  { %v1088_v41 = vld [vmem:[#allocation7] sm:$0xf]  ;;  %v871_v43 = vld [vmem:[#allocation8 + $0x60] sm:$0xff]  ;;  %v869_v55 = vld [vmem:[#allocation8 + $0x50] sm:$0xff] }
  0x2f   :  { %v127_v44 = vperm.slane %v1088_v41, 0  ;;  %v128_v45 = vperm.slane %v1088_v41, 1  ;;  %v862_v47 = vld [vmem:[#allocation8 + $0x18] sm:$0xff]  ;;  %v860_v57 = vld [vmem:[#allocation8 + $0x8] sm:$0xff]  ;;  %v859_v3 = vld [vmem:[#allocation8] sm:$0xff]  ;;  %v129_v24 = vperm.slane %v1088_v41, 2 }
  0x30   :  { %301 = vmatpush.bf16.msra.mxu0 %v650_v7  ;;  %328 = vmatpush.bf16.msra.mxu2 %v674_v17  ;;  %v870_v48 = vld [vmem:[#allocation8 + $0x58] sm:$0xff]  ;;  %v868_v58 = vld [vmem:[#allocation8 + $0x48] sm:$0xff]  ;;  %v867_v4 = vld [vmem:[#allocation8 + $0x40] sm:$0xff]  ;;  %v130_v29 = vperm.slane %v1088_v41, 3 }
  0x31   :  { %315 = vmatpush.bf16.msra.mxu1 %v654_v11  ;;  %342 = vmatpush.bf16.msra.mxu3 %v678_v18 }
  0x34   :  { %302 = vmatpush.bf16.msra.mxu0 %v634_v19  ;;  %329 = vmatpush.bf16.msra.mxu2 %v658_v27 }
  0x35   :  { %316 = vmatpush.bf16.msra.mxu1 %v638_v23  ;;  %343 = vmatpush.bf16.msra.mxu3 %v662_v28 }
  0x37   :  { %303 = vmatmul.bf16.vlgmr.msra.gmra.mxu0 %v92_v26 }
  0x38   :  { %317 = vmatmul.bf16.vlgmr.msra.gmra.mxu1 %v92_v26  ;;  %330 = vmatpush.bf16.msra.mxu2 %v642_v33 }
  0x39   :  { %344 = vmatpush.bf16.msra.mxu3 %v646_v34  ;;  %565 = vmatpush.bf16.msrb.mxu0 %v866_v35 }
  0x3a   :  { %579 = vmatpush.bf16.msrb.mxu1 %v874_v36 }
  0x3b   :  { %331 = vmatmul.bf16.vlgmr.msra.gmra.mxu2 %v92_v26 }
  0x3c   :  { %345 = vmatmul.bf16.vlgmr.msra.gmra.mxu3 %v92_v26 }
  0x3d   :  { %566 = vmatpush.bf16.msrb.mxu0 %v865_v37 }
  0x3e   :  { %580 = vmatpush.bf16.msrb.mxu1 %v873_v38 }
  0x41   :  { %567 = vmatpush.bf16.msrb.mxu0 %v864_v39 }
  0x42   :  { %581 = vmatpush.bf16.msrb.mxu1 %v872_v40 }
  0x45   :  { %568 = vmatpush.bf16.msrb.mxu0 %v863_v42 }
  0x46   :  { %582 = vmatpush.bf16.msrb.mxu1 %v871_v43 }
  0x49   :  { %569 = vmatpush.bf16.msrb.mxu0 %v862_v47 }
  0x4a   :  { %583 = vmatpush.bf16.msrb.mxu1 %v870_v48 }
  0x4d   :  { %570 = vmatpush.bf16.msrb.mxu0 %v861_v54 }
  0x4e   :  { %584 = vmatpush.bf16.msrb.mxu1 %v869_v55 }
  0x51   :  { %571 = vmatpush.bf16.msrb.mxu0 %v860_v57 }
  0x52   :  { %585 = vmatpush.bf16.msrb.mxu1 %v868_v58 }
  0x55   :  { %572 = vmatpush.bf16.msrb.mxu0 %v859_v3 }
  0x56   :  { %586 = vmatpush.bf16.msrb.mxu1 %v867_v4 }
  0xb4   :  { %v304_v46 = vpop.f32.mrf.mxu0 }
  0xb5   :  { %v1092_v49 = vadd.f32 %v304_v46, %v127_v44  ;;  %v318_v50 = vpop.f32.mrf.mxu1 }
  0xb6   :  { %v1094_v51 = vadd.f32 %v318_v50, %v128_v45 }
  0xb7   :  { %v759_v52 = vmul.f32 -1.442695, %v1092_v49 }
  0xb8   :  { %v760_v53 = vmul.f32 -1.442695, %v1094_v51 }
  0xb9   :  { %888 = vpow2.f32 %v759_v52 }
  0xba   :  { %890 = vpow2.f32 %v760_v53 }
  0xbc   :  { %v306_v56 = vpop.f32.mrf.mxu0 }
  0xbd   :  { %v1098_v59 = vadd.f32 %v306_v56, %v127_v44  ;;  %v320_v60 = vpop.f32.mrf.mxu1 }
  0xbe   :  { %v1100_v61 = vadd.f32 %v320_v60, %v128_v45  ;;  %v332_v18 = vpop.f32.mrf.mxu2 }
  0xbf   :  { %v889_v62 = vpop.eup %888  ;;  %v761_v63 = vmul.f32 -1.442695, %v1098_v59  ;;  %v346_v25 = vpop.f32.mrf.mxu3  ;;  %v333_v40 = vadd.f32 %v332_v18, %v129_v24 }
  0xc0   :  { %v891_v0 = vpop.eup %890  ;;  %v363_v1 = vadd.f32 1.0, %v889_v62  ;;  %v762_v2 = vmul.f32 -1.442695, %v1100_v61 }
  0xc1   :  { %v364_v5 = vadd.f32 1.0, %v891_v0  ;;  %892 = vpow2.f32 %v761_v63 }
  0xc2   :  { %894 = vrcp.f32 %v363_v1  ;;  %v376_v21 = vand.u32 2147483647, %v363_v1  ;;  %v378_v22 = vand.u32 2147483648, %v363_v1  ;;  %vm372_vm1 = vweird.f32 %v363_v1 }
  0xc3   :  { %896 = vrcp.f32 %v364_v5  ;;  %v391_v28 = vand.u32 2147483647, %v364_v5  ;;  %vm387_vm4 = vweird.f32 %v364_v5  ;;  %v393_v32 = vand.u32 2147483648, %v364_v5 }
  0xc4   :  { %898 = vpow2.f32 %v762_v2  ;;  %vm377_vm5 = vcmp.eq.f32.partialorder %v376_v21, 8.507059e+37  ;;  %v379_v34 = vor.u32 1.1754944e-38, %v378_v22  ;;  %v347_v2 = vadd.f32 %v346_v25, %v130_v29 }
  0xc5   :  { %vm392_vm8 = vcmp.eq.f32.partialorder %v391_v28, 8.507059e+37  ;;  %v394_v44 = vor.u32 1.1754944e-38, %v393_v32 }
  0xc6   :  { %v334_v52 = vpop.f32.mrf.mxu2 }
  0xc7   :  { %v893_v6 = vpop.eup %892  ;;  %v335_v62 = vadd.f32 %v334_v52, %v129_v24  ;;  %v348_v63 = vpop.f32.mrf.mxu3 }
  0xc8   :  { %v895_v7 = vpop.eup %894  ;;  %v365_v8 = vadd.f32 1.0, %v893_v6  ;;  %v349_v6 = vadd.f32 %v348_v63, %v130_v29 }
  0xc9   :  { %v897_v9 = vpop.eup %896  ;;  %v368_v10 = vmul.f32 %v895_v7, %v363_v1  ;;  %vm373_vm0 = vweird.f32 %v895_v7 }
  0xca   :  { %v899_v11 = vpop.eup %898  ;;  %v383_v12 = vmul.f32 %v897_v9, %v364_v5  ;;  %900 = vrcp.f32 %v365_v8  ;;  %vm1108_vm2 = vmor %vm372_vm1, %vm373_vm0  ;;  %vm388_vm3 = vweird.f32 %v897_v9  ;;  %v408_v35 = vand.u32 2147483648, %v365_v8 }
  0xcb   :  { %v369_v13 = vsub.f32 1.0, %v368_v10  ;;  %v1104_v14 = vadd.f32 1.0, %v899_v11  ;;  %vm1116_vm6 = vmor %vm387_vm4, %vm388_vm3  ;;  %v406_v39 = vand.u32 2147483647, %v365_v8  ;;  %vm402_vm9 = vweird.f32 %v365_v8 }
  0xcc   :  { %v384_v15 = vsub.f32 1.0, %v383_v12  ;;  %v409_v47 = vor.u32 1.1754944e-38, %v408_v35 }
  0xcd   :  { %v370_v16 = vmul.f32 %v895_v7, %v369_v13  ;;  %902 = vrcp.f32 %v1104_v14  ;;  %v423_v46 = vand.u32 2147483648, %v1104_v14  ;;  %v421_v50 = vand.u32 2147483647, %v1104_v14 }
  0xce   :  { %v385_v17 = vmul.f32 %v897_v9, %v384_v15  ;;  %vm407_vm12 = vcmp.eq.f32.partialorder %v406_v39, 8.507059e+37  ;;  %vm417_vm13 = vweird.f32 %v1104_v14 }
  0xcf   :  { %v371_v19 = vadd.f32 %v895_v7, %v370_v16  ;;  %v424_v60 = vor.u32 1.1754944e-38, %v423_v46  ;;  %vm422_vm15 = vcmp.eq.f32.partialorder %v421_v50, 8.507059e+37 }
  0xd0   :  { %v901_v20 = vpop.eup %900  ;;  %v386_v27 = vadd.f32 %v897_v9, %v385_v17 }
  0xd1   :  { %v398_v23 = vmul.f32 %v901_v20, %v365_v8  ;;  %v375_v31 = vsel %vm1108_vm2, %v895_v7, %v371_v19  ;;  %vm403_vm7 = vweird.f32 %v901_v20 }
  0xd2   :  { %v380_v41 = vsel %vm377_vm5, %v379_v34, %v375_v31  ;;  %v390_v42 = vsel %vm1116_vm6, %v897_v9, %v386_v27  ;;  %vm404_vm10 = vmor %vm402_vm9, %vm403_vm7 }
  0xd3   :  { %v903_v30 = vpop.eup %902  ;;  %v399_v33 = vsub.f32 1.0, %v398_v23  ;;  %v427_v53 = vmul.f32 %v380_v41, %v1092_v49  ;;  %v395_v54 = vsel %vm392_vm8, %v394_v44, %v390_v42 }
  0xd4   :  { %v413_v36 = vmul.f32 %v903_v30, %v1104_v14  ;;  %vm418_vm11 = vweird.f32 %v903_v30  ;;  %v428_v0 = vmul.f32 %v395_v54, %v1094_v51  ;;  %v887_v51 = vld [vmem:[%s1142_s4] ss:$0 sm:$0xff] }
  0xd5   :  { %v400_v38 = vmul.f32 %v901_v20, %v399_v33  ;;  %vm419_vm14 = vmor %vm417_vm13, %vm418_vm11  ;;  %v431_v49 = vmul.f32 %v427_v53, %v333_v40 }
  0xd6   :  { %v414_v43 = vsub.f32 1.0, %v413_v36  ;;  %v432_v8 = vmul.f32 %v428_v0, %v347_v2 }
  0xd7   :  { %v401_v45 = vadd.f32 %v901_v20, %v400_v38 }
  0xd8   :  { %v415_v48 = vmul.f32 %v903_v30, %v414_v43 }
  0xd9   :  { %v405_v55 = vsel %vm404_vm10, %v901_v20, %v401_v45 }
  0xda   :  { %v410_v56 = vsel %vm407_vm12, %v409_v47, %v405_v55  ;;  %v416_v57 = vadd.f32 %v903_v30, %v415_v48 }
  0xdb   :  { %v429_v58 = vmul.f32 %v410_v56, %v1098_v59 }
  0xdc   :  { %v420_v1 = vsel %vm419_vm14, %v903_v30, %v416_v57 }
  0xdd   :  { %v425_v3 = vsel %vm422_vm15, %v424_v60, %v420_v1  ;;  %v433_v4 = vmul.f32 %v429_v58, %v335_v62 }
  0xde   :  { %v430_v5 = vmul.f32 %v425_v3, %v1100_v61 }
  0xdf   :  { %v435_v7 = vpack.c.bf16 %v433_v4, %v431_v49 }
  0xe0   :  { %v434_v9 = vmul.f32 %v430_v5, %v349_v6 }
  0xe1   :  { %573 = vmatmul.bf16.vlgmr.msrb.gmra.mxu0 %v435_v7 }
  0xe2   :  { %v436_v59 = vpack.c.bf16 %v434_v9, %v432_v8 }
  0xe4   :  { %587 = vmatmul.bf16.vlgmr.msrb.gmra.mxu1 %v436_v59 }
 0x15e   :  { %v574_v10 = vpop.f32.mrf.mxu0 }
 0x161   :  { %v588_v11 = vpop.f32.mrf.mxu1 }
 0x162   :  { %v589_v12 = vadd.f32 %v588_v11, %v574_v10 }
 0x164   :  { %v606_v13 = vadd.f32 %v887_v51, %v589_v12 }
 0x166   :  { %v576_v14 = vpop.f32.mrf.mxu0  ;;  %608 = vst [vmem:[#allocation10] sm:$0xff] %v606_v13 }
 0x169   :  { %v590_v15 = vpop.f32.mrf.mxu1 }
 0x16a   :  { %v591_v16 = vadd.f32 %v590_v15, %v576_v14 }
 0x16c   :  { %v607_v61 = vadd.f32 %v887_v51, %v591_v16 }
 0x16e   :  { %609 = vst [vmem:[#allocation10 + $0x8] sm:$0xff] %v607_v61 }
 0x16f   :  { %622 = dma.vmem_to_hbm [thread:$0]  %s615_s18, 256, %s617_s21, [#allocation4], %s1036_s30, %s1036_s30, %s1037_s6  }
 0x170   :  { %1030 = dma.done.wait [#allocation4], 256  }
 0x171   :  { %1031 = vsyncadd [#allocation4], 4294967040 }
 0x172   :  { %627 = vsyncpa [#allocation3], 1 }
 0x173   :  { %628 = vsyncpa [#allocation6], 1 }
 0x174   :  { %629 = vsyncpa [#allocation9], 1 }
 0x175   :  { %630 = vsyncpa [#allocation4], 1 }

</bundles_post_ra>
